<compile_context>
chip_gen: v6e
topology: v6e:2x2x1
jax: 0.10.0
libtpu: 0.0.40
codegen_flags: <defaults>
</compile_context>

<pallas_src>
import functools

import jax
import jax.numpy as jnp
from jax.experimental import pallas as pl
from jax.experimental.pallas import tpu as pltpu


def _round_up(v, m):
    return (v + m - 1) // m * m


def _temporal_block_kernel(x_ref, w_ref, b_ref, o_ref, *scratch, k, dilation,
                           pad, L, LP, D0, PW, TB, C_in, C_out, CP, M1,
                           has_downsample, use_slab, mxu_dtype):
    """One grid step = TB batch elements, full (padded) sequence.

    scratch (in order):
      buf    : VMEM (CP, TB*PW)   mxu_dtype  left-padded per-batch sequences
      slab   : VMEM (k*CP, TB*LP) mxu_dtype  im2col slab   (only if use_slab)
      res_sc : VMEM (CP, TB*LP)   f32        downsample residual (if present)
    """
    rest = list(scratch)
    buf = rest.pop(0)
    slab = rest.pop(0) if use_slab else None
    res_sc = rest.pop(0) if has_downsample else None
    f32 = jnp.float32

    # ---- stage x: zero left-pad cols + padded-channel rows, copy x ---------
    # (all stores below start at lane-aligned columns; buf data columns
    #  [D0+L, D0+LP) are never zeroed - they only feed output columns >= L,
    #  which the wrapper strips.)
    for n in range(TB):
        base = n * PW
        if D0 > 0:
            buf[:, base:base + D0] = jnp.zeros((CP, D0), mxu_dtype)
        buf[:C_in, base + D0:base + D0 + L] = x_ref[n].astype(mxu_dtype)
        if C_in < CP:
            buf[C_in:CP, base + D0:base + D0 + LP] = jnp.zeros(
                (CP - C_in, LP), mxu_dtype)

    def epilogue(n, h2_cols):
        # dropout2: identity (inference).  Final residual add + ReLU.
        if has_downsample:
            out_n = jnp.maximum(h2_cols + res_sc[:, n * LP:(n + 1) * LP], 0.0)
            o_ref[n] = out_n.astype(o_ref.dtype)
        else:
            # identity residual re-read from x_ref (no extra round-trip
            # through the mxu_dtype staging buffer).
            res_n = x_ref[n].astype(f32)
            out_n = jnp.maximum(h2_cols[:C_out, :L] + res_n, 0.0)
            o_ref[n, :C_out, :L] = out_n.astype(o_ref.dtype)

    if use_slab:
        # ---- small-CP path: one (M, k*CP) @ (k*CP, TB*LP) matmul per conv --
        def build_slab():
            for n in range(TB):
                for j in range(k):
                    s = n * PW + D0 - pad + j * dilation
                    slab[j * CP:(j + 1) * CP, n * LP:(n + 1) * LP] = \
                        buf[:, s:s + LP]

        build_slab()
        y = jnp.dot(w_ref[:M1, :], slab[...],
                    preferred_element_type=f32) + b_ref[:M1, :]
        h1 = jnp.maximum(y[:CP], 0.0)            # conv1 -> chomp -> relu
        if has_downsample:
            res_sc[...] = y[CP:M1]               # spill; not live across conv2
        # dropout1: identity.  Stage h1 for conv2 (left-pad cols still zero).
        for n in range(TB):
            buf[:, n * PW + D0:n * PW + D0 + LP] = \
                h1[:, n * LP:(n + 1) * LP].astype(mxu_dtype)
        build_slab()
        h2 = jnp.maximum(
            jnp.dot(w_ref[M1:, :], slab[...],
                    preferred_element_type=f32) + b_ref[M1:, :], 0.0)
        for n in range(TB):
            epilogue(n, h2[:, n * LP:(n + 1) * LP])
    else:
        # ---- large-CP path: no slab; accumulate k matmuls per batch from ---
        # ---- shifted buf views (full-width contraction per tap). -----------
        for n in range(TB):
            base = n * PW
            y = None
            for j in range(k):
                s = base + D0 - pad + j * dilation
                c = jnp.dot(w_ref[:M1, j * CP:(j + 1) * CP], buf[:, s:s + LP],
                            preferred_element_type=f32)
                y = c if y is None else y + c
            y = y + b_ref[:M1, :]
            h1 = jnp.maximum(y[:CP], 0.0)
            if has_downsample:
                res_sc[:, n * LP:(n + 1) * LP] = y[CP:M1]
            buf[:, base + D0:base + D0 + LP] = h1.astype(mxu_dtype)
            h2 = None
            for j in range(k):
                s = base + D0 - pad + j * dilation
                c = jnp.dot(w_ref[M1:, j * CP:(j + 1) * CP], buf[:, s:s + LP],
                            preferred_element_type=f32)
                h2 = c if h2 is None else h2 + c
            h2 = jnp.maximum(h2 + b_ref[M1:, :], 0.0)
            epilogue(n, h2)


def temporal_block_forward(x, w1, b1, w2, b2, wd, bd, *, kernel_size, stride,
                           dilation, padding, mxu_dtype=jnp.bfloat16,
                           out_dtype=jnp.float32, batch_tile=None,
                           use_slab=None,
                           vmem_budget_bytes=40 * 1024 * 1024):
    """x: (B, C_in, L).  w1: (C_out, C_in, k), w2: (C_out, C_out, k),
    wd: (C_out, C_in) or None, biases 1-D.  Returns (B, C_out, L) out_dtype.

    mxu_dtype=bf16 (MXU-native on v5e/v6e/v7x) by default; accumulation, bias
    add and the residual epilogue stay f32.  Pass mxu_dtype=jnp.float32 for
    results that match an f32 reference bit-for-bit (up to accumulation order).
    """
    # TODO(synk): only stride=1 (standard TCN config) is supported here.
    assert stride == 1
    # Residual add requires output length == L, i.e. padding == (k-1)*dilation.
    assert padding == (kernel_size - 1) * dilation

    B, C_in, L = x.shape
    C_out = w1.shape[0]
    has_downsample = wd is not None
    if not has_downsample:
        assert C_in == C_out, "identity residual requires C_in == C_out"

    k, pad = kernel_size, padding
    itm = jnp.dtype(mxu_dtype).itemsize
    packing = 8 * (4 // itm)                    # sublane packing quantum
    CP = _round_up(max(C_in, C_out), packing)   # padded channel dim
    LP = _round_up(L, 128)                      # padded sequence dim (lanes)
    D0 = _round_up(pad, 128)                    # 128-aligned data start
    PW = D0 + LP                                # per-batch stride (mult of 128)
    KD = k * CP                                 # im2col contraction dim
    M1 = 2 * CP if has_downsample else CP       # rows of fused conv1 matmul
    if use_slab is None:
        use_slab = CP < 128                     # large CP: per-tap matmuls

    # ---- pack weights into fused, channel-padded im2col slabs --------------
    f32 = jnp.float32
    w1_f = jnp.zeros((CP, k, CP), f32).at[:C_out, :, :C_in].set(
        jnp.transpose(w1.astype(f32), (0, 2, 1))).reshape(CP, KD)
    w2_f = jnp.zeros((CP, k, CP), f32).at[:C_out, :, :C_out].set(
        jnp.transpose(w2.astype(f32), (0, 2, 1))).reshape(CP, KD)
    b1_f = jnp.zeros((CP, 1), f32).at[:C_out, 0].set(b1.astype(f32))
    b2_f = jnp.zeros((CP, 1), f32).at[:C_out, 0].set(b2.astype(f32))
    if has_downsample:
        # embed wd at the last tap so `wd_f @ slab1 == wd @ x`
        wd_f = jnp.zeros((CP, k, CP), f32).at[:C_out, k - 1, :C_in].set(
            wd.astype(f32)).reshape(CP, KD)
        bd_f = jnp.zeros((CP, 1), f32).at[:C_out, 0].set(bd.astype(f32))
        w_all = jnp.concatenate([w1_f, wd_f, w2_f], axis=0)   # (M1+CP, KD)
        b_all = jnp.concatenate([b1_f, bd_f, b2_f], axis=0)   # (M1+CP, 1)
    else:
        w_all = jnp.concatenate([w1_f, w2_f], axis=0)
        b_all = jnp.concatenate([b1_f, b2_f], axis=0)
    w_all = w_all.astype(mxu_dtype)             # biases stay f32
    out_itm = jnp.dtype(out_dtype).itemsize

    # ---- VMEM-budget-driven batch folding (amortize ~0.35us/step) ----------
    def _est_vmem(t):
        e = CP * t * PW * itm                        # buf scratch
        if use_slab:
            e += KD * t * LP * itm                   # im2col slab
        if has_downsample:
            e += CP * t * LP * 4                     # residual scratch (f32)
        e += 2 * t * C_in * L * itm                  # x block, double-buffered
        e += 2 * t * CP * LP * out_itm               # out block, double-buffered
        e += 2 * (w_all.size * itm + b_all.size * 4)  # weights / biases
        e += 3 * M1 * t * LP * 4                     # f32 intermediates headroom
        return e

    if batch_tile is None:
        batch_tile = 1
        for t in range(1, B + 1):
            if B % t:
                continue
            if B >= 2 and B // t < 2:
                continue                             # keep >=2 steps (v7x: 2 TCs)
            if _est_vmem(t) <= vmem_budget_bytes:
                batch_tile = t
    TB = batch_tile
    assert B % TB == 0
    vmem_limit = int(min(max(2 * _est_vmem(TB), 32 << 20), 100 << 20))

    kernel = functools.partial(
        _temporal_block_kernel,
        k=k, dilation=dilation, pad=pad, L=L, LP=LP, D0=D0, PW=PW, TB=TB,
        C_in=C_in, C_out=C_out, CP=CP, M1=M1,
        has_downsample=has_downsample, use_slab=use_slab, mxu_dtype=mxu_dtype)

    scratch = [pltpu.VMEM((CP, TB * PW), mxu_dtype)]           # buf
    if use_slab:
        scratch.append(pltpu.VMEM((KD, TB * LP), mxu_dtype))   # im2col slab
    if has_downsample:
        scratch.append(pltpu.VMEM((CP, TB * LP), jnp.float32))  # residual

    out_pad = pl.pallas_call(
        kernel,
        out_shape=jax.ShapeDtypeStruct((B, CP, LP), out_dtype),
        grid_spec=pltpu.PrefetchScalarGridSpec(
            num_scalar_prefetch=0,
            grid=(B // TB,),
            in_specs=[
                pl.BlockSpec((TB, C_in, L), lambda gb: (gb, 0, 0)),
                pl.BlockSpec(w_all.shape, lambda gb: (0, 0)),
                pl.BlockSpec(b_all.shape, lambda gb: (0, 0)),
            ],
            out_specs=pl.BlockSpec((TB, CP, LP), lambda gb: (gb, 0, 0)),
            scratch_shapes=scratch,
        ),
        compiler_params=pltpu.CompilerParams(
            dimension_semantics=("parallel",),
            vmem_limit_bytes=vmem_limit),
    )(x.astype(mxu_dtype), w_all, b_all)

    # Strip channel/lane padding (a no-op when C_out % packing == 0 and
    # L % 128 == 0; otherwise a consumer wanting to avoid the copy can keep
    # the padded slab by calling with aligned shapes).
    return out_pad[:, :C_out, :L]


# ----------------------------- reference (pure JAX) -------------------------
def _ref_forward(x, w1, b1, w2, b2, wd, bd, *, dilation, padding):
    def conv(h, w, b):
        dn = jax.lax.conv_dimension_numbers(h.shape, w.shape,
                                            ('NCH', 'OIH', 'NCH'))
        y = jax.lax.conv_general_dilated(
            h, w, window_strides=(1,), padding=[(padding, padding)],
            rhs_dilation=(dilation,), dimension_numbers=dn)
        y = y + b[None, :, None]
        return y if padding == 0 else y[:, :, :-padding]       # Chomp1d

    out = jnp.maximum(conv(x, w1, b1), 0.0)            # conv1 -> chomp -> relu
    out = jnp.maximum(conv(out, w2, b2), 0.0)          # conv2 -> chomp -> relu
    if wd is not None:
        res = jnp.einsum('oc,bcl->bol', wd, x) + bd[None, :, None]
    else:
        res = x
    return jnp.maximum(out + res, 0.0)


def _weight_norm(v, g):
    # torch.nn.utils.weight_norm, dim=0: W = g * v / ||v||  (norm over dims 1,2)
    norm = jnp.sqrt(jnp.sum(v * v, axis=(1, 2), keepdims=True))
    return g[:, None, None] * v / norm


if __name__ == "__main__":
    key = jax.random.PRNGKey(0)

    # ---- config 1: C_in != C_out (1x1 downsample present) ------------------
    B, C_in, C_out, L = 2, 4, 8, 16
    k, stride, dilation = 3, 1, 2
    padding = (k - 1) * dilation

    ks = jax.random.split(key, 9)
    w1 = _weight_norm(0.01 * jax.random.normal(ks[0], (C_out, C_in, k), jnp.float32),
                      jax.random.uniform(ks[1], (C_out,), jnp.float32, 0.5, 1.5))
    b1 = 0.01 * jax.random.normal(ks[2], (C_out,), jnp.float32)
    w2 = _weight_norm(0.01 * jax.random.normal(ks[3], (C_out, C_out, k), jnp.float32),
                      jax.random.uniform(ks[4], (C_out,), jnp.float32, 0.5, 1.5))
    b2 = 0.01 * jax.random.normal(ks[5], (C_out,), jnp.float32)
    wd = 0.01 * jax.random.normal(ks[6], (C_out, C_in), jnp.float32)
    bd = 0.01 * jax.random.normal(ks[7], (C_out,), jnp.float32)
    x = jax.random.normal(ks[8], (B, C_in, L), jnp.float32)

    ref = _ref_forward(x, w1, b1, w2, b2, wd, bd,
                       dilation=dilation, padding=padding)

    # test 1: default bf16 MXU path, downsample, im2col-slab path
    out = temporal_block_forward(
        x, w1, b1, w2, b2, wd, bd,
        kernel_size=k, stride=stride, dilation=dilation, padding=padding)
    out = jax.block_until_ready(out)
    assert out.shape == (B, C_out, L)
    assert jnp.allclose(out, ref, atol=5e-2, rtol=5e-2), (
        float(jnp.max(jnp.abs(out - ref))))

    # test 2: f32 MXU path (tight tolerance), downsample, slab-free path
    out2 = temporal_block_forward(
        x, w1, b1, w2, b2, wd, bd,
        kernel_size=k, stride=stride, dilation=dilation, padding=padding,
        mxu_dtype=jnp.float32, use_slab=False)
    out2 = jax.block_until_ready(out2)
    assert jnp.allclose(out2, ref, atol=1e-4, rtol=1e-4), (
        float(jnp.max(jnp.abs(out2 - ref))))

    # ---- config 2: C_in == C_out (identity residual, no downsample) --------
    C, k2, dil2 = 8, 2, 1
    pad2 = (k2 - 1) * dil2
    ks2 = jax.random.split(jax.random.PRNGKey(1), 7)
    w1b = _weight_norm(0.01 * jax.random.normal(ks2[0], (C, C, k2), jnp.float32),
                       jax.random.uniform(ks2[1], (C,), jnp.float32, 0.5, 1.5))
    b1b = 0.01 * jax.random.normal(ks2[2], (C,), jnp.float32)
    w2b = _weight_norm(0.01 * jax.random.normal(ks2[3], (C, C, k2), jnp.float32),
                       jax.random.uniform(ks2[4], (C,), jnp.float32, 0.5, 1.5))
    b2b = 0.01 * jax.random.normal(ks2[5], (C,), jnp.float32)
    xb = jax.random.normal(ks2[6], (B, C, L), jnp.float32)

    ref_b = _ref_forward(xb, w1b, b1b, w2b, b2b, None, None,
                         dilation=dil2, padding=pad2)

    # test 3: f32, identity residual, slab path
    out_b = temporal_block_forward(
        xb, w1b, b1b, w2b, b2b, None, None,
        kernel_size=k2, stride=1, dilation=dil2, padding=pad2,
        mxu_dtype=jnp.float32)
    out_b = jax.block_until_ready(out_b)
    assert out_b.shape == (B, C, L)
    assert jnp.allclose(out_b, ref_b, atol=1e-4, rtol=1e-4), (
        float(jnp.max(jnp.abs(out_b - ref_b))))

    print("KERNEL_OK")
</pallas_src>

<mosaic_0001>
module attributes {stable_mosaic.version = 11 : i64} {
  func.func @_temporal_block_kernel(%arg0: i32, %arg1: memref<1x4x16xbf16, #tpu.memory_space<vmem>>, %arg2: memref<48x48xbf16, #tpu.memory_space<vmem>>, %arg3: memref<48x1xf32, #tpu.memory_space<vmem>>, %arg4: memref<1x16x128xf32, #tpu.memory_space<vmem>>, %arg5: memref<16x256xbf16, #tpu.memory_space<vmem>>, %arg6: memref<48x128xbf16, #tpu.memory_space<vmem>>, %arg7: memref<16x128xf32, #tpu.memory_space<vmem>>) attributes {dimension_semantics = [#tpu.dimension_semantics<parallel>], iteration_bounds = array<i64: 2>, scalar_prefetch = 0 : i64, scratch_operands = 3 : i64, tpu.core_type = #tpu.core_type<tc>, window_params = [{transform_indices = @transform_0, window_bounds = array<i64: 1, 4, 16>}, {pipeline_mode = #tpu.pipeline_mode<synchronous>, transform_indices = @transform_1, window_bounds = array<i64: 48, 48>}, {pipeline_mode = #tpu.pipeline_mode<synchronous>, transform_indices = @transform_2, window_bounds = array<i64: 48, 1>}, {transform_indices = @transform_3, window_bounds = array<i64: 1, 16, 128>}]} {
    %cst = arith.constant 0.000000e+00 : bf16
    %0 = vector.broadcast %cst : bf16 to vector<16x128xbf16>
    %c0 = arith.constant 0 : index
    %c0_0 = arith.constant 0 : index
    %1 = vector.load %arg5[%c0, %c0_0] : memref<16x256xbf16, #tpu.memory_space<vmem>>, vector<16x128xbf16>
    tpu.vector_store %arg5[%c0, %c0_0], %0 {strides = array<i32>} : memref<16x256xbf16, #tpu.memory_space<vmem>>, vector<16x128xbf16>,
    %c0_1 = arith.constant 0 : index
    %c0_2 = arith.constant 0 : index
    %c0_3 = arith.constant 0 : index
    %2 = vector.load %arg1[%c0_1, %c0_2, %c0_3] : memref<1x4x16xbf16, #tpu.memory_space<vmem>>, vector<1x4x16xbf16>
    %3 = vector.shape_cast %2 : vector<1x4x16xbf16> to vector<4x16xbf16>
    %c0_4 = arith.constant 0 : index
    %c128 = arith.constant 128 : index
    %4 = vector.load %arg5[%c0_4, %c128] : memref<16x256xbf16, #tpu.memory_space<vmem>>, vector<4x16xbf16>
    tpu.vector_store %arg5[%c0_4, %c128], %3 {strides = array<i32>} : memref<16x256xbf16, #tpu.memory_space<vmem>>, vector<4x16xbf16>,
    %cst_5 = arith.constant 0.000000e+00 : bf16
    %5 = vector.broadcast %cst_5 : bf16 to vector<12x128xbf16>
    %c4 = arith.constant 4 : index
    %c128_6 = arith.constant 128 : index
    %6 = vector.load %arg5[%c4, %c128_6] : memref<16x256xbf16, #tpu.memory_space<vmem>>, vector<12x128xbf16>
    tpu.vector_store %arg5[%c4, %c128_6], %5 {strides = array<i32>} : memref<16x256xbf16, #tpu.memory_space<vmem>>, vector<12x128xbf16>,
    %c0_7 = arith.constant 0 : index
    %c124 = arith.constant 124 : index
    %7 = vector.load %arg5[%c0_7, %c124] : memref<16x256xbf16, #tpu.memory_space<vmem>>, vector<16x128xbf16>
    %c0_8 = arith.constant 0 : index
    %c0_9 = arith.constant 0 : index
    %8 = vector.load %arg6[%c0_8, %c0_9] : memref<48x128xbf16, #tpu.memory_space<vmem>>, vector<16x128xbf16>
    tpu.vector_store %arg6[%c0_8, %c0_9], %7 {strides = array<i32>} : memref<48x128xbf16, #tpu.memory_space<vmem>>, vector<16x128xbf16>,
    %c0_10 = arith.constant 0 : index
    %c126 = arith.constant 126 : index
    %9 = vector.load %arg5[%c0_10, %c126] : memref<16x256xbf16, #tpu.memory_space<vmem>>, vector<16x128xbf16>
    %c16 = arith.constant 16 : index
    %c0_11 = arith.constant 0 : index
    %10 = vector.load %arg6[%c16, %c0_11] : memref<48x128xbf16, #tpu.memory_space<vmem>>, vector<16x128xbf16>
    tpu.vector_store %arg6[%c16, %c0_11], %9 {strides = array<i32>} : memref<48x128xbf16, #tpu.memory_space<vmem>>, vector<16x128xbf16>,
    %c0_12 = arith.constant 0 : index
    %c128_13 = arith.constant 128 : index
    %11 = vector.load %arg5[%c0_12, %c128_13] : memref<16x256xbf16, #tpu.memory_space<vmem>>, vector<16x128xbf16>
    %c32 = arith.constant 32 : index
    %c0_14 = arith.constant 0 : index
    %12 = vector.load %arg6[%c32, %c0_14] : memref<48x128xbf16, #tpu.memory_space<vmem>>, vector<16x128xbf16>
    tpu.vector_store %arg6[%c32, %c0_14], %11 {strides = array<i32>} : memref<48x128xbf16, #tpu.memory_space<vmem>>, vector<16x128xbf16>,
    %c0_15 = arith.constant 0 : index
    %c0_16 = arith.constant 0 : index
    %13 = vector.load %arg2[%c0_15, %c0_16] : memref<48x48xbf16, #tpu.memory_space<vmem>>, vector<32x48xbf16>
    %c0_17 = arith.constant 0 : index
    %c0_18 = arith.constant 0 : index
    %14 = vector.load %arg6[%c0_17, %c0_18] : memref<48x128xbf16, #tpu.memory_space<vmem>>, vector<48x128xbf16>
    %cst_19 = arith.constant dense<0.000000e+00> : vector<32x128xf32>
    %15 = tpu.matmul %13, %14, %cst_19 {dimension_numbers = #tpu.dot_dimension_numbers<[1], [0], [0], [1], [0, 0, 1, 1], [], []>} : vector<32x48xbf16>, vector<48x128xbf16>, vector<32x128xf32> -> vector<32x128xf32>
    %c0_20 = arith.constant 0 : index
    %c0_21 = arith.constant 0 : index
    %16 = vector.load %arg3[%c0_20, %c0_21] : memref<48x1xf32, #tpu.memory_space<vmem>>, vector<32x1xf32>
    %17 = vector.broadcast %16 : vector<32x1xf32> to vector<32x128xf32>
    %18 = arith.addf %15, %17 : vector<32x128xf32>
    %19 = vector.extract_strided_slice %18 {offsets = [0, 0], sizes = [16, 128], strides = [1, 1]} : vector<32x128xf32> to vector<16x128xf32>
    %cst_22 = arith.constant 0.000000e+00 : f32
    %20 = vector.broadcast %cst_22 : f32 to vector<16x128xf32>
    %21 = arith.maximumf %19, %20 : vector<16x128xf32>
    %22 = vector.extract_strided_slice %18 {offsets = [16, 0], sizes = [16, 128], strides = [1, 1]} : vector<32x128xf32> to vector<16x128xf32>
    %c0_23 = arith.constant 0 : index
    %c0_24 = arith.constant 0 : index
    %23 = vector.load %arg7[%c0_23, %c0_24] : memref<16x128xf32, #tpu.memory_space<vmem>>, vector<16x128xf32>
    tpu.vector_store %arg7[%c0_23, %c0_24], %22 {strides = array<i32>} : memref<16x128xf32, #tpu.memory_space<vmem>>, vector<16x128xf32>,
    %24 = arith.truncf %21 : vector<16x128xf32> to vector<16x128xbf16>
    %c0_25 = arith.constant 0 : index
    %c128_26 = arith.constant 128 : index
    %25 = vector.load %arg5[%c0_25, %c128_26] : memref<16x256xbf16, #tpu.memory_space<vmem>>, vector<16x128xbf16>
    tpu.vector_store %arg5[%c0_25, %c128_26], %24 {strides = array<i32>} : memref<16x256xbf16, #tpu.memory_space<vmem>>, vector<16x128xbf16>,
    %c0_27 = arith.constant 0 : index
    %c124_28 = arith.constant 124 : index
    %26 = vector.load %arg5[%c0_27, %c124_28] : memref<16x256xbf16, #tpu.memory_space<vmem>>, vector<16x128xbf16>
    %c0_29 = arith.constant 0 : index
    %c0_30 = arith.constant 0 : index
    %27 = vector.load %arg6[%c0_29, %c0_30] : memref<48x128xbf16, #tpu.memory_space<vmem>>, vector<16x128xbf16>
    tpu.vector_store %arg6[%c0_29, %c0_30], %26 {strides = array<i32>} : memref<48x128xbf16, #tpu.memory_space<vmem>>, vector<16x128xbf16>,
    %c0_31 = arith.constant 0 : index
    %c126_32 = arith.constant 126 : index
    %28 = vector.load %arg5[%c0_31, %c126_32] : memref<16x256xbf16, #tpu.memory_space<vmem>>, vector<16x128xbf16>
    %c16_33 = arith.constant 16 : index
    %c0_34 = arith.constant 0 : index
    %29 = vector.load %arg6[%c16_33, %c0_34] : memref<48x128xbf16, #tpu.memory_space<vmem>>, vector<16x128xbf16>
    tpu.vector_store %arg6[%c16_33, %c0_34], %28 {strides = array<i32>} : memref<48x128xbf16, #tpu.memory_space<vmem>>, vector<16x128xbf16>,
    %c0_35 = arith.constant 0 : index
    %c128_36 = arith.constant 128 : index
    %30 = vector.load %arg5[%c0_35, %c128_36] : memref<16x256xbf16, #tpu.memory_space<vmem>>, vector<16x128xbf16>
    %c32_37 = arith.constant 32 : index
    %c0_38 = arith.constant 0 : index
    %31 = vector.load %arg6[%c32_37, %c0_38] : memref<48x128xbf16, #tpu.memory_space<vmem>>, vector<16x128xbf16>
    tpu.vector_store %arg6[%c32_37, %c0_38], %30 {strides = array<i32>} : memref<48x128xbf16, #tpu.memory_space<vmem>>, vector<16x128xbf16>,
    %c32_39 = arith.constant 32 : index
    %c0_40 = arith.constant 0 : index
    %32 = vector.load %arg2[%c32_39, %c0_40] : memref<48x48xbf16, #tpu.memory_space<vmem>>, vector<16x48xbf16>
    %c0_41 = arith.constant 0 : index
    %c0_42 = arith.constant 0 : index
    %33 = vector.load %arg6[%c0_41, %c0_42] : memref<48x128xbf16, #tpu.memory_space<vmem>>, vector<48x128xbf16>
    %cst_43 = arith.constant dense<0.000000e+00> : vector<16x128xf32>
    %34 = tpu.matmul %32, %33, %cst_43 {dimension_numbers = #tpu.dot_dimension_numbers<[1], [0], [0], [1], [0, 0, 1, 1], [], []>} : vector<16x48xbf16>, vector<48x128xbf16>, vector<16x128xf32> -> vector<16x128xf32>
    %c32_44 = arith.constant 32 : index
    %c0_45 = arith.constant 0 : index
    %35 = vector.load %arg3[%c32_44, %c0_45] : memref<48x1xf32, #tpu.memory_space<vmem>>, vector<16x1xf32>
    %36 = vector.broadcast %35 : vector<16x1xf32> to vector<16x128xf32>
    %37 = arith.addf %34, %36 : vector<16x128xf32>
    %cst_46 = arith.constant 0.000000e+00 : f32
    %38 = vector.broadcast %cst_46 : f32 to vector<16x128xf32>
    %39 = arith.maximumf %37, %38 : vector<16x128xf32>
    %c0_47 = arith.constant 0 : index
    %c0_48 = arith.constant 0 : index
    %40 = vector.load %arg7[%c0_47, %c0_48] : memref<16x128xf32, #tpu.memory_space<vmem>>, vector<16x128xf32>
    %41 = arith.addf %39, %40 : vector<16x128xf32>
    %cst_49 = arith.constant 0.000000e+00 : f32
    %42 = vector.broadcast %cst_49 : f32 to vector<16x128xf32>
    %43 = arith.maximumf %41, %42 : vector<16x128xf32>
    %c0_50 = arith.constant 0 : index
    %c0_51 = arith.constant 0 : index
    %c0_52 = arith.constant 0 : index
    %44 = vector.load %arg4[%c0_50, %c0_51, %c0_52] : memref<1x16x128xf32, #tpu.memory_space<vmem>>, vector<1x16x128xf32>
    %45 = vector.shape_cast %44 : vector<1x16x128xf32> to vector<16x128xf32>
    %46 = vector.shape_cast %43 : vector<16x128xf32> to vector<1x16x128xf32>
    tpu.vector_store %arg4[%c0_50, %c0_51, %c0_52], %46 {strides = array<i32>} : memref<1x16x128xf32, #tpu.memory_space<vmem>>, vector<1x16x128xf32>,
    return
  }
  func.func @transform_0(%arg0: i32) -> (i32, i32, i32) {
    %c0_i32 = arith.constant 0 : i32
    %c0_i32_0 = arith.constant 0 : i32
    %c0_i32_1 = arith.constant 0 : i32
    return %arg0, %c0_i32, %c0_i32_0 : i32, i32, i32
  }
  func.func @transform_1(%arg0: i32) -> (i32, i32) {
    %c0_i32 = arith.constant 0 : i32
    %c0_i32_0 = arith.constant 0 : i32
    %c0_i32_1 = arith.constant 0 : i32
    return %c0_i32, %c0_i32_0 : i32, i32
  }
  func.func @transform_2(%arg0: i32) -> (i32, i32) {
    %c0_i32 = arith.constant 0 : i32
    %c0_i32_0 = arith.constant 0 : i32
    %c0_i32_1 = arith.constant 0 : i32
    return %c0_i32, %c0_i32_0 : i32, i32
  }
  func.func @transform_3(%arg0: i32) -> (i32, i32, i32) {
    %c0_i32 = arith.constant 0 : i32
    %c0_i32_0 = arith.constant 0 : i32
    %c0_i32_1 = arith.constant 0 : i32
    return %arg0, %c0_i32, %c0_i32_0 : i32, i32, i32
  }
}

</mosaic_0001>

<bundles_post_ra>
// kernel: tpu_custom_call.1
= control target key start
LH: loop header
LB: loop body
LE: loop exit
PB: predicated region body
PF: predicated region fallthrough
CT: control target
= control target key end

     0   :  { %8 = vsyncpa [#allocation6], 0  ;;  %s911_s0 = inlined_call_operand.vmem [shape: bf16[2,4,16], index: 0, kind: input, shape index: {}]   ;;  %s912_s1 = inlined_call_operand.vmem [shape: bf16[48,48], index: 1, kind: input, shape index: {}]   ;;  %s913_s2 = inlined_call_operand.vmem [shape: f32[48,1], index: 2, kind: input, shape index: {}]   ;;  %s914_s3 = inlined_call_operand.hbm [shape: f32[2,16,128], index: 3, kind: output, shape index: {}]  }
   0x1   :  { %10 = vsyncpa [#allocation6 + $0x1], 0  ;;  %s757_s12 = smov 0   ;;  %s759_s13 = smov 0  }
   0x2   :  { %s761_s14 = smov 0   ;;  %s763_s15 = smov 0  }
   0x3 LB: > { %s778_s16 = sadd.s32 4294967295, %s727_s15   ;;  %s553_s17 = sadd.s32 4294967294, %s727_s15   ;;  %s727_s15 = sphi %s763_s15, %s920_s15   ;;  %s723_s14 = sphi %s761_s14, %s919_s14   ;;  %s719_s13 = sphi %s759_s13, %s918_s13   ;;  %s715_s12 = sphi %s757_s12, %s917_s12  }
   0x4   : > { %s782_s18 = sadd.s32 1, %s727_s15   ;;  %s91_s19 = sadd.s32 1, %s723_s14 }
   0x5   : > { %s88_s20 = ssub.s32 %s727_s15, %s782_s18  ;;  %p101_p0 = scmp.ne.s32.totalorder %s723_s14, %s719_s13 }
   0x6   : > { %p89_p1 = scmp.eq.s32.totalorder %s88_s20, 0  ;;  %p102_p2 = scmp.eq.s32.totalorder %s778_s16, 1 }
   0x7   : > { %p107_p3 = scmp.ne.s32.totalorder %s719_s13, %s715_s12  ;;  %p108_p4 = scmp.eq.s32.totalorder %s553_s17, 1 }
   0x8   : > { %s793_s21 = scalar_select %p89_p1, %s723_s14, %s91_s19  }
   0x9   : > { %p795_p5 = por %p102_p2, %p101_p0  ;;  %p799_p6 = por %p108_p4, %p107_p3 }
   0xa   : > { %p556_p7 = scmp.ge.s32.totalorder %s727_s15, 1  ;;  %p139_p8 = scmp.lt.s32.totalorder %s727_s15, 3 }
   0xc   : > { %p140_p9 = pnand %p556_p7, %p139_p8 }
   0xd   : > { %p162_p10 = scmp.lt.s32.totalorder (!%p140_p9), %s778_s16, 1  ;;  %s730_s29 = smov (!%p140_p9), 2  }
   0xe   : > { %143 = sbr.rel (%p140_p9) target bundleno = 735 (0x2df), region = 32  ;;  %s731_s30 = smov (!%p140_p9), 4  }
   0xf   : > { %s159_s4 = sand.u32 (!%p140_p9), 1, %s719_s13   ;;  %s580_s8 = sshll.u32 (!%p140_p9), %s778_s16, 8 }
  0x10   : > { %s557_s5 = sshll.u32 (!%p140_p9), %s159_s4, 4  ;;  %s869_s11 = scalar_lea.hbm (!%p140_p9), %s914_s3, %s580_s8 }
  0x11   : > { %s161_s6 = scalar_lea.vmem (!%p140_p9), [#allocation5], %s557_s5  ;;  %s871_s17 = scalar_lea.sflag (!%p140_p9), [#allocation6], %s159_s4 }
  0x12   : > { %s491_s7 = sshll.u32 (!%p140_p9), %s161_s6, 4  ;;  %s864_s7 = int_to_ptr.vmem [resolvable:$true] %s491_s7 }
  0x13   : > { %v729_v0 = vmov 0   ;;  %s163_s24 = scalar_select %p162_p10, %s778_s16, 1  ;;  %vm170_vm0 = vcmask 123904   ;;  %v661_v7 = vld [vmem:[%s912_s1] sm:$0xff]   ;;  %vm274_vm1 = vcmask 392192   ;;  %v223_v9 = vld [vmem:[%s913_s2 + $0x8] sm:$0xff] }
  0x14   : > { %167 = vst [vmem:[#allocation2] sm:$0xf] %v729_v0  ;;  %172 = vst [vmem:[#allocation2 + $0x4] sm:$0xc] %v729_v0  ;;  %656 = vset.pattern.permute.xlu0 %v729_v0  ;;  %657 = vset.pattern.permute.xlu1 %v729_v0  ;;  %v222_v8 = vld [vmem:[%s913_s2] sm:$0xff]  ;;  %vm201_vm2 = vcmask 15360  }
  0x15   : > { %168 = vst [vmem:[#allocation2 + $0x8] sm:$0xf] %v729_v0  ;;  %173 = vst [vmem:[#allocation2 + $0xc] sm:$0xf] %v729_v0  ;;  %s558_s25 = sshll.u32 %s163_s24, 1  ;;  %596 = vmatprep.mubr.msk.bf16.mxu0 %vm274_vm1, %v661_v7  ;;  %vm184_vm3 = vcmask 31744  }
  0x16   : > { %s165_s28 = scalar_lea.vmem %s911_s0, %s558_s25  ;;  %v662_v24 = vld [vmem:[%s912_s1 + $0x8] sm:$0xff]   ;;  %v732_v25 = vmov 0.0   ;;  %v388_v42 = vld [vmem:[%s913_s2 + $0x20] sm:$0xff]  ;;  %v224_v43 = vld [vmem:[%s913_s2 + $0x10] sm:$0xff]  ;;  %vm733_vm4 = vmmov 0   ;;  %s667_s19 = scalar_lea.vmem %s864_s7, 256 }
  0x17   : > { %v169_v1 = vld [vmem:[%s165_s28] sm:$0x3]  ;;  %600 = vmatprep.subr.bf16.mxu1 %v732_v25  ;;  %v389_v44 = vld [vmem:[%s913_s2 + $0x28] sm:$0xff]  ;;  %606 = vmatprep.mubr.msk.bf16.mxu1 %vm733_vm4, %v732_v25  ;;  %v225_v46 = vld [vmem:[%s913_s2 + $0x18] sm:$0xff]  ;;  %p668_p11 = scmp.ne.s32.totalorder %s864_s7, %s667_s19  ;;  %s734_s16 = smov [#allocation5]  }
  0x18   : > { %171 = vst.msk [vmem:[#allocation2 + $0x4] sm:$0x3] %vm170_vm0, %v169_v1  ;;  %v666_v61 = vld [vmem:[%s912_s1 + $0x10] sm:$0xff]   ;;  %s671_s20 = sshll.u32 %s734_s16, 4  ;;  %s672_s20 = int_to_ptr.vmem [resolvable:$false] %s671_s20 }
  0x19   : > { %p669_p12 = pnand %p668_p11, %p795_p5  ;;  %s673_s24 = scalar_lea.vmem %s672_s20, 512 }
  0x1a   : > { %p674_p0 = scmp.lt.s32.totalorder %s864_s7, %s672_s20  ;;  %p675_p1 = scmp.lt.s32.totalorder %s673_s24, %s667_s19 }
  0x1b   : > { %p670_p13 = pneg %p669_p12 }
  0x1c   : > { %v209_v2 = vld [vmem:[#allocation2 + $0xc] sm:$0xf]  ;;  %p676_p2 = por %p675_p1, %p674_p0 }
  0x1d   : > { %211 = vst [vmem:[#allocation3 + $0x14] sm:$0xf] %v209_v2  ;;  %v192_v5 = vld [vmem:[#allocation2 + $0x8] sm:$0xff] }
  0x1e   : > { %p677_p3 = pnand %p676_p2, %p670_p13 }
  0x1f   : > { %v191_v3 = vld [vmem:[#allocation2] sm:$0xff] }
  0x20   : > { %v208_v4 = vld [vmem:[#allocation2 + $0x4] sm:$0xf]  ;;  %195 = vrot.lane.b32.xlu0 %v191_v3, %s730_s29  ;;  %178 = vrot.lane.b32.xlu1 %v191_v3, %s731_s30 }
  0x21   : > { %210 = vst [vmem:[#allocation3 + $0x10] sm:$0xf] %v208_v4 }
  0x24   : > { %197 = vrot.lane.b32.xlu0 %v192_v5, %s730_s29  ;;  %180 = vrot.lane.b32.xlu1 %v192_v5, %s731_s30 }
  0x28   : > { %v658_v6 = vld [vmem:[#allocation3 + $0x10] sm:$0xff]   ;;  %228 = vperm.xlu0 %656, %v222_v8   ;;  %233 = vperm.xlu1 %657, %v223_v9  }
  0x29   : > { %590 = vmatprep.subr.bf16.mxu0 %v658_v6 }
  0x2a   : > { %591 = vmatpush3.bf16.msra.mxu0 %v658_v6 }
  0x92   : > { %v196_v10 = vpop.permute.xlu0 %195  ;;  %v179_v11 = vpop.permute.xlu1 %178 }
  0x93   : > { %v199_v12 = vrot.slane %v196_v10, 4  ;;  %v182_v13 = vrot.slane %v179_v11, 4 }
  0x95   : > { %v202_v14 = vsel %vm201_vm2, %v196_v10, %v199_v12  ;;  %v185_v15 = vsel %vm184_vm3, %v179_v11, %v182_v13 }
  0x96   : > { %206 = vst [vmem:[#allocation3 + $0x8] sm:$0xf] %v202_v14  ;;  %189 = vst [vmem:[#allocation3] sm:$0xf] %v185_v15  ;;  %v198_v16 = vpop.permute.xlu0 %197  ;;  %v181_v17 = vpop.permute.xlu1 %180 }
  0x97   : > { %v200_v18 = vrot.slane %v198_v16, 4  ;;  %v183_v19 = vrot.slane %v181_v17, 4 }
  0x99   : > { %v203_v20 = vsel %vm201_vm2, %v198_v16, %v200_v18  ;;  %v186_v21 = vsel %vm184_vm3, %v181_v17, %v183_v19 }
  0x9a   : > { %207 = vst [vmem:[#allocation3 + $0xc] sm:$0xf] %v203_v20  ;;  %190 = vst [vmem:[#allocation3 + $0x4] sm:$0xf] %v186_v21 }
  0xa1   : > { %v659_v22 = vld [vmem:[#allocation3 + $0x8] sm:$0xff]   ;;  %v660_v23 = vld [vmem:[#allocation3] sm:$0xff]  }
  0xa2   : > { %592 = vmatprep.subr.bf16.mxu0 %v659_v22 }
  0xa3   : > { %593 = vmatpush3.bf16.msra.mxu0 %v659_v22  ;;  %v229_v27 = vpop.permute.xlu0 %228  ;;  %v234_v31 = vpop.permute.xlu1 %233 }
  0xa4   : > { %594 = vmatprep.subr.bf16.mxu0 %v660_v23 }
  0xa7   : > { %595 = vmatpush3.bf16.msra.mxu0 %v660_v23 }
  0xaa   : > { %597 = vmatmul.mubr.msk.bf16.vlgmr.msra.gmra.mxu0 %vm274_vm1, %v662_v24 }
 0x16a   : > { %v832_v26 = vpop.f32.mrf.mxu0 }
 0x16c   : > { %v315_v28 = vpop.f32.mrf.mxu0 }
 0x16d   : > { %v316_v29 = vadd.f32 %v315_v28, %v229_v27 }
 0x16e   : > { %v834_v30 = vpop.f32.mrf.mxu0 }
 0x16f   : > { %v330_v32 = vmax.f32 %v316_v29, 0.0 }
 0x170   : > { %v318_v33 = vpop.f32.mrf.mxu0 }
 0x171   : > { %v578_v34 = vpack.c.bf16 %v330_v32, %v330_v32  ;;  %v319_v35 = vadd.f32 %v318_v33, %v234_v31 }
 0x173   : > { %342 = vst [vmem:[#allocation2 + $0x4] sm:$0xf] %v578_v34  ;;  %v331_v36 = vmax.f32 %v319_v35, 0.0 }
 0x175   : > { %v579_v37 = vpack.c.bf16 %v331_v36, %v331_v36 }
 0x177   : > { %343 = vst [vmem:[#allocation2 + $0xc] sm:$0xf] %v579_v37 }
 0x17a   : > { %v360_v38 = vld [vmem:[#allocation2] sm:$0xff] }
 0x17b   : > { %v376_v39 = vld [vmem:[#allocation2 + $0x4] sm:$0xf]  ;;  %364 = vrot.lane.b32.xlu1 %v360_v38, %s730_s29 }
 0x17c   : > { %378 = vst [vmem:[#allocation3 + $0x10] sm:$0xf] %v376_v39 }
 0x17e   : > { %v361_v40 = vld [vmem:[#allocation2 + $0x8] sm:$0xff] }
 0x17f   : > { %v377_v41 = vld [vmem:[#allocation2 + $0xc] sm:$0xf]  ;;  %348 = vrot.lane.b32.xlu1 %v360_v38, %s731_s30  ;;  %366 = vrot.lane.b32.xlu0 %v361_v40, %s730_s29 }
 0x180   : > { %379 = vst [vmem:[#allocation3 + $0x14] sm:$0xf] %v377_v41 }
 0x183   : > { %392 = vperm.xlu1 %657, %v388_v42   ;;  %350 = vrot.lane.b32.xlu0 %v361_v40, %s731_s30 }
 0x187   : > { %v663_v45 = vld [vmem:[#allocation3 + $0x10] sm:$0xff]   ;;  %238 = vperm.xlu1 %657, %v224_v43   ;;  %397 = vperm.xlu0 %656, %v389_v44  }
 0x188   : > { %601 = vmatpush3.bf16.msra.mxu1 %v663_v45 }
 0x189   : > { %602 = vmatprep.subr.bf16.mxu1 %v732_v25 }
 0x18b   : > { %243 = vperm.xlu0 %656, %v225_v46  }
 0x1ed   : > { %v365_v47 = vpop.permute.xlu1 %364 }
 0x1ee   : > { %v368_v48 = vrot.slane %v365_v47, 4 }
 0x1f0   : > { %v370_v49 = vsel %vm201_vm2, %v365_v47, %v368_v48 }
 0x1f1   : > { %374 = vst [vmem:[#allocation3 + $0x8] sm:$0xf] %v370_v49  ;;  %v367_v50 = vpop.permute.xlu0 %366  ;;  %v349_v51 = vpop.permute.xlu1 %348 }
 0x1f2   : > { %v369_v52 = vrot.slane %v367_v50, 4  ;;  %v352_v53 = vrot.slane %v349_v51, 4 }
 0x1f4   : > { %v371_v54 = vsel %vm201_vm2, %v367_v50, %v369_v52  ;;  %v354_v55 = vsel %vm184_vm3, %v349_v51, %v352_v53 }
 0x1f5   : > { %375 = vst [vmem:[#allocation3 + $0xc] sm:$0xf] %v371_v54  ;;  %358 = vst [vmem:[#allocation3] sm:$0xf] %v354_v55  ;;  %v351_v56 = vpop.permute.xlu0 %350 }
 0x1f6   : > { %v353_v57 = vrot.slane %v351_v56, 4 }
 0x1f8   : > { %v355_v58 = vsel %vm184_vm3, %v351_v56, %v353_v57 }
 0x1f9   : > { %359 = vst [vmem:[#allocation3 + $0x4] sm:$0xf] %v355_v58 }
 0x1fc   : > { %v664_v59 = vld [vmem:[#allocation3 + $0x8] sm:$0xff]  }
 0x1fd   : > { %603 = vmatpush3.bf16.msra.mxu1 %v664_v59 }
 0x1fe   : > { %604 = vmatprep.subr.bf16.mxu1 %v732_v25  ;;  %v393_v62 = vpop.permute.xlu1 %392 }
 0x200   : > { %v665_v60 = vld [vmem:[#allocation3] sm:$0xff]  }
 0x201   : > { %605 = vmatpush3.bf16.msra.mxu1 %v665_v60 }
 0x202   : > { %v398_v63 = vpop.permute.xlu0 %397  ;;  %v239_v0 = vpop.permute.xlu1 %238 }
 0x203   : > { %v324_v4 = vadd.f32 %v832_v26, %v239_v0 }
 0x204   : > { %607 = vmatmul.mubr.msk.bf16.vlgmr.msra.gmra.mxu1 %vm274_vm1, %v666_v61 }
 0x206   : > { %v244_v6 = vpop.permute.xlu0 %243 }
 0x207   : > { %v327_v11 = vadd.f32 %v834_v30, %v244_v6 }
 0x2c4   : > { %v460_v1 = vpop.f32.mrf.mxu1 }
 0x2c5   : > { %v461_v2 = vadd.f32 %v460_v1, %v393_v62 }
 0x2c6   : > { %v608_v3 = vpop.f32.mrf.mxu1 }
 0x2c7   : > { %v467_v5 = vmax.f32 %v461_v2, 0.0 }
 0x2c8   : > { %v463_v7 = vpop.f32.mrf.mxu1 }
 0x2c9   : > { %v471_v8 = vadd.f32 %v467_v5, %v324_v4  ;;  %v464_v9 = vadd.f32 %v463_v7, %v398_v63 }
 0x2ca   : > { %v609_v10 = vpop.f32.mrf.mxu1 }
 0x2cb   : > { %v473_v12 = vmax.f32 %v471_v8, 0.0  ;;  %v468_v13 = vmax.f32 %v464_v9, 0.0 }
 0x2cd   : > { %475 = vst [vmem:[%s161_s6] sm:$0xff] %v473_v12  ;;  %v472_v14 = vadd.f32 %v468_v13, %v327_v11 }
 0x2cf   : > { %v474_v15 = vmax.f32 %v472_v14, 0.0 }
 0x2d1   : > { %476 = vst [vmem:[%s161_s6 + $0x8] sm:$0xff] %v474_v15 }
 0x2d2   : > { %680 = shalt.err (!%p677_p3)
}
 0x2d3   : > { %s681_s25 = scalar_lea.hbm %s869_s11, 256  ;;  %s685_s28 = scalar_lea.hbm %s914_s3, 512 }
 0x2d4   : > { %p682_p4 = scmp.ne.s32.totalorder %s869_s11, %s681_s25  ;;  %p686_p9 = scmp.lt.s32.totalorder %s869_s11, %s914_s3 }
 0x2d5   : > { %p687_p10 = scmp.lt.s32.totalorder %s685_s28, %s681_s25 }
 0x2d6   : > { %p683_p7 = pnand %p682_p4, %p795_p5 }
 0x2d7   : > { %p688_p11 = por %p687_p10, %p686_p9 }
 0x2d8   : > { %p684_p8 = pneg %p683_p7 }
 0x2da   : > { %p689_p12 = pnand %p688_p11, %p684_p8 }
 0x2dc   : > { %692 = shalt.err (!%p689_p12)
}
 0x2dd   : > { %s735_s4 = smov 128   ;;  %s736_s5 = smov 8  }
 0x2de   : > { %610 = dma.vmem_to_hbm [thread:$0]  (%p795_p5), %s864_s7, 256, %s869_s11, %s871_s17, %s735_s4, %s735_s4, %s736_s5  }
 0x2df PF: > { %p616_p13 = scmp.ge.s32.totalorder %s727_s15, 2  ;;  %s506_s6 = sand.u32 1, %s715_s12  }
 0x2e0   : > { %s507_s8 = scalar_lea.sflag [#allocation6], %s506_s6 }
 0x2e1   : > { %p613_p0 = pnand %p616_p13, %p799_p6 }
 0x2e3   : > { %p614_p1 = pneg %p613_p0 }
 0x2e5   : > { %710 = dma.done.wait (%p614_p1), %s507_s8, 256  }
 0x2e6   : > { %712 = vsyncadd (%p614_p1), %s507_s8, 4294967040  ;;  %p13_p2 = scmp.ge.s32.totalorder %s782_s18, 4   ;;  %s917_s12 = smov %s719_s13 }
 0x2e7   : > { %s918_s13 = smov %s723_s14  ;;  %s919_s14 = smov %s793_s21 }
 0x2e8   : > { %s920_s15 = smov %s782_s18  ;;  %15 = sbr.rel (!%p13_p2) target bundleno = 3 (0x3), region = 67 }
 0x2ed   :  { %512 = vsyncpa [#allocation6], 1 }
 0x2ee   :  { %514 = vsyncpa [#allocation6 + $0x1], 1 }

</bundles_post_ra>
